<compile_context>
chip_gen: v5e
topology: v5e:2x2
jax: 0.10.0
libtpu: 0.0.40
codegen_flags: <defaults>
</compile_context>

<pallas_src>
import jax
import jax.numpy as jnp
import numpy as np
from jax.experimental import pallas as pl
from jax.experimental.pallas import tpu as pltpu

BN_EPS = 1e-5  # nn.BatchNorm2d default eps


# ---------------------------------------------------------------------------
# Pallas kernel: reparametrized "same" conv2d + bias + ReLU (whole batch, one step)
# ---------------------------------------------------------------------------
def _make_conv_kernel(H, W, N, KH, KW, pad_h, pad_w):
    HW = H * W
    NHW = N * HW

    def kernel(x_ref, w_ref, b_ref, m_ref, o_ref):
        # x_ref: (Cin, N*HW)          images concatenated along the lane axis
        # w_ref: (Cout, KH*KW*Cin)    reparametrized kernel, tap-major rows
        # b_ref: (Cout, 1)            reparametrized bias
        # m_ref: (KH*KW*Cin, N*HW)    0/1 validity mask (padding + image-boundary wrap)
        # o_ref: (Cout, N*HW)
        x = x_ref[...]

        # Build the im2col slab: one rolled view per tap (XLU lane rotation,
        # co-issues with the MXU), stacked along sublanes.  Any position whose
        # rolled value comes from outside its own image (padding halo or the
        # wrap into the neighbouring image on the concatenated lane axis) is
        # zeroed by the single mask multiply below.
        slabs = []
        for kh in range(KH):
            dh = kh - pad_h
            for kw in range(KW):
                dw = kw - pad_w
                off = dh * W + dw
                if off == 0:
                    slabs.append(x)                              # center tap
                else:
                    slabs.append(pltpu.roll(x, (-off) % NHW, 1))
        im2col = jnp.concatenate(slabs, axis=0) * m_ref[...]     # (KH*KW*Cin, N*HW)

        # TODO(synk): on v6e/v7x a bf16 cast of w/im2col here (keeping f32
        # accumulation) would halve operand bytes for production MobileOne
        # shapes; kept f32 so the 1e-4 f32 reference tolerance holds exactly.
        acc = jnp.dot(w_ref[...], im2col, preferred_element_type=jnp.float32)

        # Single bias add + ReLU + lane-dense (N*HW = 512 = 4x128) store.
        o_ref[...] = jnp.maximum(acc + b_ref[...], 0.0).astype(o_ref.dtype)

    return kernel


def conv2d_bias_relu(x_nchw, w_oihw, bias, *, stride=1, padding=0):
    """Reparametrized MobileOne conv + bias + ReLU.  PyTorch NCHW in/out."""
    N, Cin, H, W = x_nchw.shape
    Cout, Cin_w, KH, KW = w_oihw.shape
    # TODO(synk): stride != 1, groups != 1 (depthwise) and non-'same' padding
    # are not implemented; the tested block config is stride=1, groups=1, k=3, pad=1.
    assert stride == 1 and Cin_w == Cin
    assert KH == KW and KH % 2 == 1 and padding == KH // 2

    HW = H * W
    NHW = N * HW
    # Whole-problem-in-one-block scheme: lane axis must be 128-dense and the
    # full (KH*KW*Cin, N*HW) im2col slab must fit VMEM.  For production
    # MobileOne shapes (HW >= 3136, C up to 1024) add an HW-blocked halo path
    # instead of growing this kernel (and re-derive blocks for 64 MiB on v7x).
    assert NHW % 128 == 0, "lane axis (N*H*W) must be a multiple of 128"

    # NCHW -> (Cin, N*HW): images concatenated along the lane axis.
    x_flat = jnp.transpose(x_nchw, (1, 0, 2, 3)).reshape(Cin, NHW)
    # (Cout, Cin, KH, KW) -> (Cout, KH*KW*Cin): tap-major then Cin, matching
    # the im2col row order built in the kernel.
    w_mat = (jnp.transpose(w_oihw, (0, 2, 3, 1))
             .reshape(Cout, KH * KW * Cin).astype(jnp.float32))
    b2d = bias.reshape(Cout, 1).astype(jnp.float32)

    # Static 0/1 validity mask per im2col row (depends only on geometry).
    p = np.arange(NHW)
    hw = p % HW                       # position within its own image
    hh, ww = hw // W, hw % W
    rows = []
    for kh in range(KH):
        dh = kh - padding
        for kw in range(KW):
            dw = kw - padding
            ok = ((hh + dh >= 0) & (hh + dh < H) &
                  (ww + dw >= 0) & (ww + dw < W)).astype(np.float32)
            rows.append(np.broadcast_to(ok, (Cin, NHW)))
    mask = jnp.asarray(np.concatenate(rows, axis=0))  # (KH*KW*Cin, N*HW)

    cost = pl.CostEstimate(
        flops=2 * Cout * KH * KW * Cin * NHW,
        transcendentals=0,
        bytes_accessed=4 * (x_flat.size + w_mat.size + b2d.size
                            + mask.size + Cout * NHW),
    )

    # Single grid step (no grid): whole batch, one DMA wave in, one matmul,
    # one store out.  No pipelining bookkeeping, no per-step fixed cost.
    out = pl.pallas_call(
        _make_conv_kernel(H, W, N, KH, KW, padding, padding),
        out_shape=jax.ShapeDtypeStruct((Cout, NHW), x_nchw.dtype),
        cost_estimate=cost,
    )(x_flat, w_mat, b2d, mask)

    # (Cout, N*HW) -> NCHW
    return jnp.transpose(out.reshape(Cout, N, H, W), (1, 0, 2, 3))


# ---------------------------------------------------------------------------
# Parameter setup + reparametrization (plain JAX, mirrors fuse()/fuse_kernel_bn)
# ---------------------------------------------------------------------------
def _bn_params(key, c):
    k1, k2, k3, k4 = jax.random.split(key, 4)
    gamma = 1.0 + 0.3 * jax.random.normal(k1, (c,), jnp.float32)
    beta = 0.1 * jax.random.normal(k2, (c,), jnp.float32)
    mean = 0.1 * jax.random.normal(k3, (c,), jnp.float32)
    var = 0.5 + jax.random.uniform(k4, (c,), jnp.float32)   # running_var > 0
    return gamma, beta, mean, var


def fuse_kernel_bn(kernel, bn):
    gamma, beta, mean, var = bn
    std = jnp.sqrt(var + BN_EPS)
    t = (gamma / std).reshape(-1, 1, 1, 1)
    return kernel * t, beta - mean * gamma / std


def make_mobileone_params(key, in_ch, out_ch, k, num_conv_branches, stride=1):
    keys = jax.random.split(key, 3 + 2 * num_conv_branches)
    has_skip = (in_ch == out_ch) and (stride == 1)        # ignore_skip logic
    has_scale = k > 1                                     # ignore_scale logic
    params = {
        "skip_bn": _bn_params(keys[0], in_ch) if has_skip else None,
        "scale_w": (0.2 * jax.random.normal(keys[1], (out_ch, in_ch, 1, 1), jnp.float32)
                    if has_scale else None),
        "scale_bn": _bn_params(keys[2], out_ch) if has_scale else None,
        "conv_ws": [],
        "conv_bns": [],
    }
    for i in range(num_conv_branches):
        params["conv_ws"].append(
            0.2 * jax.random.normal(keys[3 + 2 * i], (out_ch, in_ch, k, k), jnp.float32))
        params["conv_bns"].append(_bn_params(keys[4 + 2 * i], out_ch))
    # Note: MobileOneBlock.fuse() drops per-branch conv biases, so none are
    # created (the eval-mode output is identical either way).
    return params


def reparametrize(params, in_ch, out_ch, k, groups=1):
    pad = k // 2
    total_k = jnp.zeros((out_ch, in_ch // groups, k, k), jnp.float32)
    total_b = jnp.zeros((out_ch,), jnp.float32)
    # scale branch: fuse 1x1 conv with its BN, zero-pad to k x k
    if params["scale_bn"] is not None:
        sk, sb = fuse_kernel_bn(params["scale_w"], params["scale_bn"])
        total_k = total_k + jnp.pad(sk, ((0, 0), (0, 0), (pad, pad), (pad, pad)))
        total_b = total_b + sb
    # skip branch: identity kernel (SkipBranch default kernel_size=3) fused with BN.
    if params["skip_bn"] is not None:
        assert k == 3, "SkipBranch id-kernel is 3x3 (module default)"
        input_dim = in_ch // groups
        idx = jnp.arange(in_ch)
        id_k = jnp.zeros((out_ch, input_dim, 3, 3), jnp.float32)
        id_k = id_k.at[idx, idx % input_dim, 1, 1].set(1.0)
        kk, kb = fuse_kernel_bn(id_k, params["skip_bn"])
        total_k = total_k + kk
        total_b = total_b + kb
    # kxk conv branches
    for w, bn in zip(params["conv_ws"], params["conv_bns"]):
        ck, cb = fuse_kernel_bn(w, bn)
        total_k = total_k + ck
        total_b = total_b + cb
    return total_k, total_b


# ---------------------------------------------------------------------------
# Pure-JAX reference (multi-branch eval-mode forward) for verification
# ---------------------------------------------------------------------------
def _bn_eval(x_nchw, bn):
    gamma, beta, mean, var = bn
    inv = (gamma / jnp.sqrt(var + BN_EPS)).reshape(1, -1, 1, 1)
    return (x_nchw - mean.reshape(1, -1, 1, 1)) * inv + beta.reshape(1, -1, 1, 1)


def _conv_nchw(x, w, stride, padding):
    return jax.lax.conv_general_dilated(
        x, w, window_strides=(stride, stride),
        padding=((padding, padding), (padding, padding)),
        dimension_numbers=("NCHW", "OIHW", "NCHW"))


def mobileone_reference(x, params, k, padding):
    out = jnp.zeros_like(_conv_nchw(x, params["conv_ws"][0], 1, padding))
    if params["skip_bn"] is not None:
        out = out + _bn_eval(x, params["skip_bn"])
    if params["scale_bn"] is not None:
        out = out + _bn_eval(_conv_nchw(x, params["scale_w"], 1, 0), params["scale_bn"])
    for w, bn in zip(params["conv_ws"], params["conv_bns"]):
        out = out + _bn_eval(_conv_nchw(x, w, 1, padding), bn)
    return jnp.maximum(out, 0.0)


if __name__ == "__main__":
    # MobileOneBlock(in_channels=4, out_channels=4, kernel_size=3, stride=1,
    #                padding=1, groups=1, bias=True, num_conv_branches=2), eval mode.
    IN_CH, OUT_CH, K, PAD = 4, 4, 3, 1
    NUM_CONV_BRANCHES = 2

    key = jax.random.PRNGKey(0)
    kx, kp = jax.random.split(key)
    x = jax.random.normal(kx, (2, IN_CH, 16, 16), jnp.float32)   # NCHW, like PyTorch

    params = make_mobileone_params(kp, IN_CH, OUT_CH, K, NUM_CONV_BRANCHES, stride=1)
    rep_kernel, rep_bias = reparametrize(params, IN_CH, OUT_CH, K)

    # TODO(synk): torch.autocast(float16) context is not emulated; compute in float32.
    out = conv2d_bias_relu(x, rep_kernel, rep_bias, stride=1, padding=PAD)
    out = jax.block_until_ready(out)

    ref = mobileone_reference(x, params, K, PAD)
    np.testing.assert_allclose(np.asarray(out), np.asarray(ref), rtol=1e-4, atol=1e-4)
    print("KERNEL_OK")
</pallas_src>

<mosaic_0001>
module attributes {stable_mosaic.version = 11 : i64} {
  func.func @kernel(%arg0: memref<4x512xf32, #tpu.memory_space<vmem>>, %arg1: memref<4x36xf32, #tpu.memory_space<vmem>>, %arg2: memref<4x1xf32, #tpu.memory_space<vmem>>, %arg3: memref<36x512xf32, #tpu.memory_space<vmem>>, %arg4: memref<4x512xf32, #tpu.memory_space<vmem>>) attributes {dimension_semantics = [], scalar_prefetch = 0 : i64, scratch_operands = 0 : i64, tpu.core_type = #tpu.core_type<tc>} {
    %c0 = arith.constant 0 : index
    %c0_0 = arith.constant 0 : index
    %0 = vector.load %arg0[%c0, %c0_0] : memref<4x512xf32, #tpu.memory_space<vmem>>, vector<4x512xf32>
    %c17_i32 = arith.constant 17 : i32
    %1 = tpu.dynamic_rotate %0 by %c17_i32 dim 1 : vector<4x512xf32>, i32 -> vector<4x512xf32>
    %c16_i32 = arith.constant 16 : i32
    %2 = tpu.dynamic_rotate %0 by %c16_i32 dim 1 : vector<4x512xf32>, i32 -> vector<4x512xf32>
    %c15_i32 = arith.constant 15 : i32
    %3 = tpu.dynamic_rotate %0 by %c15_i32 dim 1 : vector<4x512xf32>, i32 -> vector<4x512xf32>
    %c1_i32 = arith.constant 1 : i32
    %4 = tpu.dynamic_rotate %0 by %c1_i32 dim 1 : vector<4x512xf32>, i32 -> vector<4x512xf32>
    %c511_i32 = arith.constant 511 : i32
    %5 = tpu.dynamic_rotate %0 by %c511_i32 dim 1 : vector<4x512xf32>, i32 -> vector<4x512xf32>
    %c497_i32 = arith.constant 497 : i32
    %6 = tpu.dynamic_rotate %0 by %c497_i32 dim 1 : vector<4x512xf32>, i32 -> vector<4x512xf32>
    %c496_i32 = arith.constant 496 : i32
    %7 = tpu.dynamic_rotate %0 by %c496_i32 dim 1 : vector<4x512xf32>, i32 -> vector<4x512xf32>
    %c495_i32 = arith.constant 495 : i32
    %8 = tpu.dynamic_rotate %0 by %c495_i32 dim 1 : vector<4x512xf32>, i32 -> vector<4x512xf32>
    %9 = tpu.concatenate %1, %2, %3, %4, %0, %5, %6, %7, %8 in 0 : vector<4x512xf32>, vector<4x512xf32>, vector<4x512xf32>, vector<4x512xf32>, vector<4x512xf32>, vector<4x512xf32>, vector<4x512xf32>, vector<4x512xf32>, vector<4x512xf32> -> vector<36x512xf32>
    %c0_1 = arith.constant 0 : index
    %c0_2 = arith.constant 0 : index
    %10 = vector.load %arg3[%c0_1, %c0_2] : memref<36x512xf32, #tpu.memory_space<vmem>>, vector<36x512xf32>
    %11 = arith.mulf %9, %10 : vector<36x512xf32>
    %c0_3 = arith.constant 0 : index
    %c0_4 = arith.constant 0 : index
    %12 = vector.load %arg1[%c0_3, %c0_4] : memref<4x36xf32, #tpu.memory_space<vmem>>, vector<4x36xf32>
    %cst = arith.constant dense<0.000000e+00> : vector<4x512xf32>
    %13 = tpu.matmul %12, %11, %cst {dimension_numbers = #tpu.dot_dimension_numbers<[1], [0], [0], [1], [0, 0, 1, 1], [], []>} : vector<4x36xf32>, vector<36x512xf32>, vector<4x512xf32> -> vector<4x512xf32>
    %c0_5 = arith.constant 0 : index
    %c0_6 = arith.constant 0 : index
    %14 = vector.load %arg2[%c0_5, %c0_6] : memref<4x1xf32, #tpu.memory_space<vmem>>, vector<4x1xf32>
    %15 = vector.broadcast %14 : vector<4x1xf32> to vector<4x512xf32>
    %16 = arith.addf %13, %15 : vector<4x512xf32>
    %cst_7 = arith.constant 0.000000e+00 : f32
    %17 = vector.broadcast %cst_7 : f32 to vector<4x512xf32>
    %18 = arith.maximumf %16, %17 : vector<4x512xf32>
    %c0_8 = arith.constant 0 : index
    %c0_9 = arith.constant 0 : index
    %19 = vector.load %arg4[%c0_8, %c0_9] : memref<4x512xf32, #tpu.memory_space<vmem>>, vector<4x512xf32>
    tpu.vector_store %arg4[%c0_8, %c0_9], %18 {strides = array<i32>} : memref<4x512xf32, #tpu.memory_space<vmem>>, vector<4x512xf32>,
    return
  }
}

</mosaic_0001>

<bundles_post_ra>
// kernel: tpu_custom_call.1
= control target key start
LH: loop header
LB: loop body
LE: loop exit
PB: predicated region body
PF: predicated region fallthrough
CT: control target
= control target key end

     0   :  { %9 = vsyncpa [#allocation3], 0  ;;  %s864_s0 = inlined_call_operand.hbm [shape: f32[4,512], index: 0, kind: input, shape index: {}]   ;;  %s865_s1 = inlined_call_operand.vmem [shape: f32[4,36], index: 1, kind: input, shape index: {}]   ;;  %s866_s2 = inlined_call_operand.vmem [shape: f32[4,1], index: 2, kind: input, shape index: {}]   ;;  %s867_s3 = inlined_call_operand.hbm [shape: f32[36,512], index: 3, kind: input, shape index: {}]   ;;  %s868_s4 = inlined_call_operand.hbm [shape: f32[4,512], index: 4, kind: output, shape index: {}]  }
   0x1   :  { %10 = vsyncpa [#allocation6], 0 }
   0x2   :  { %11 = vsyncpa [#allocation4], 0  ;;  %s17_s17 = sshll.u32 %s864_s0, 4  ;;  %s601_s18 = smov [#allocation2]   ;;  %s18_s17 = int_to_ptr.hbm [resolvable:$true] %s17_s17 }
   0x3   :  { %s19_s19 = sshll.u32 %s601_s18, 4  ;;  %s31_s22 = sshll.u32 %s867_s3, 4  ;;  %s20_s19 = int_to_ptr.vmem [resolvable:$true] %s19_s19  ;;  %s32_s22 = int_to_ptr.hbm [resolvable:$true] %s31_s22 }
   0x4   :  { %22 = dma.hbm_to_vmem [thread:$0]  %s18_s17, 256, %s20_s19, [#allocation3]  }
   0x5   :  { %s602_s23 = smov [#allocation5]   ;;  %s603_s25 = smov 512  }
   0x6   :  { %s33_s24 = sshll.u32 %s602_s23, 4  ;;  %s604_s26 = smov 32   ;;  %s34_s24 = int_to_ptr.vmem [resolvable:$true] %s33_s24 }
   0x7   :  { %39 = dma.hbm_to_vmem [thread:$0]  %s32_s22, 2560, %s34_s24, [#allocation6], %s603_s25, %s603_s25, %s604_s26  }
   0x8   :  { %595 = dma.done.wait [#allocation3], 256  }
   0x9   :  { %596 = vsyncadd [#allocation3], 4294967040 }
   0xa   :  { %597 = dma.done.wait [#allocation6], 2560  }
   0xb   :  { %598 = vsyncadd [#allocation6], 4294964736  ;;  %v646_v0 = vld [vmem:[#allocation2 + $0x8] sm:$0xff]  ;;  %v648_v1 = vld [vmem:[#allocation2] sm:$0xff]  ;;  %s605_s0 = smov 17   ;;  %s606_s3 = smov 16   ;;  %v71_v35 = vlaneseq }
   0xc   :  { %54 = vst [vmem:[#allocation1 + $0x10] ss:$2 sm:$0xff] %v646_v0  ;;  %s607_s27 = smov 15   ;;  %s608_s28 = smov 1   ;;  %vm305_vm3 = vcmask 1043456   ;;  %vm369_vm9 = vcmask 293888  }
   0xd   :  { %52 = vst [vmem:[#allocation1] ss:$2 sm:$0xff] %v648_v1  ;;  %s609_s29 = smov 127   ;;  %s610_s30 = smov 113   ;;  %v693_v36 = vand.u32 127, %v71_v35 }
   0xe   :  { %s611_s5 = smov 112   ;;  %s612_s6 = smov 111  }
   0xf   :  { %vm97_vm0 = vcmp.lt.s32.totalorder %v693_v36, 16  ;;  %vm217_vm1 = vcmp.lt.s32.totalorder %v693_v36, 112  ;;  %vm169_vm2 = vcmp.lt.s32.totalorder %v693_v36, 127  ;;  %vm145_vm4 = vcmp.lt.s32.totalorder %v693_v36, 1  ;;  %s488_s13 = sshll.u32 %s868_s4, 4  ;;  %s489_s13 = int_to_ptr.hbm [resolvable:$true] %s488_s13 }
  0x10   :  { %vm193_vm5 = vcmp.lt.s32.totalorder %v693_v36, 113  ;;  %vm241_vm6 = vcmp.lt.s32.totalorder %v693_v36, 111  ;;  %vm121_vm7 = vcmp.lt.s32.totalorder %v693_v36, 15  ;;  %vm73_vm8 = vcmp.lt.s32.totalorder %v693_v36, 17 }
  0x13   :  { %v57_v2 = vld.sshfl [vmem:[#allocation1 + $0x10] sm:$0xff pattern:$0x75316420]  ;;  %v58_v3 = vld.sshfl [vmem:[#allocation1 + $0x18] sm:$0xff pattern:$0x75316420] }
  0x14   :  { %67 = vrot.lane.b32.xlu0 %v57_v2, %s605_s0  ;;  %69 = vrot.lane.b32.xlu1 %v58_v3, %s605_s0  ;;  %80 = vst [vmem:[#allocation1 + $0x10] ss:$2 sm:$0xff] %v646_v0  ;;  %v655_v4 = vld.sshfl [vmem:[#allocation1] sm:$0xff pattern:$0x75316420] }
  0x15   :  { %v657_v5 = vld.sshfl [vmem:[#allocation1 + $0x8] sm:$0xff pattern:$0x75316420]  ;;  %v363_v3 = vld [vmem:[%s866_s2] sm:$0xf] }
  0x16   :  { %78 = vst [vmem:[#allocation1] ss:$2 sm:$0xff] %v648_v1 }
  0x1b   :  { %v84_v6 = vld.sshfl [vmem:[#allocation1 + $0x18] sm:$0xff pattern:$0x75316420]  ;;  %v83_v7 = vld.sshfl [vmem:[#allocation1 + $0x10] sm:$0xff pattern:$0x75316420] }
  0x1c   :  { %95 = vrot.lane.b32.xlu0 %v84_v6, %s606_s3  ;;  %93 = vrot.lane.b32.xlu2 %v83_v7, %s606_s3  ;;  %104 = vst [vmem:[#allocation1 + $0x10] ss:$2 sm:$0xff] %v646_v0  ;;  %v338_v7 = vld [vmem:[#allocation5 + $0x80] sm:$0xf] }
  0x1d   :  { %v82_v8 = vld.sshfl [vmem:[#allocation1 + $0x8] sm:$0xff pattern:$0x75316420]  ;;  %v663_v9 = vld.sshfl [vmem:[#allocation1] sm:$0xff pattern:$0x75316420] }
  0x1e   :  { %102 = vst [vmem:[#allocation1] ss:$2 sm:$0xff] %v648_v1 }
  0x23   :  { %v107_v10 = vld.sshfl [vmem:[#allocation1 + $0x10] sm:$0xff pattern:$0x75316420]  ;;  %v108_v11 = vld.sshfl [vmem:[#allocation1 + $0x18] sm:$0xff pattern:$0x75316420] }
  0x24   :  { %117 = vrot.lane.b32.xlu1 %v107_v10, %s607_s27  ;;  %128 = vst [vmem:[#allocation1 + $0x10] ss:$2 sm:$0xff] %v646_v0  ;;  %91 = vrot.lane.b32.xlu2 %v82_v8, %s606_s3  ;;  %v339_v8 = vld [vmem:[#allocation5 + $0x88] sm:$0xf] }
  0x25   :  { %v106_v12 = vld.sshfl [vmem:[#allocation1 + $0x8] sm:$0xff pattern:$0x75316420]  ;;  %v105_v13 = vld.sshfl [vmem:[#allocation1] sm:$0xff pattern:$0x75316420] }
  0x26   :  { %115 = vrot.lane.b32.xlu0 %v106_v12, %s607_s27  ;;  %126 = vst [vmem:[#allocation1] ss:$2 sm:$0xff] %v648_v1 }
  0x2b   :  { %v131_v14 = vld.sshfl [vmem:[#allocation1 + $0x10] sm:$0xff pattern:$0x75316420]  ;;  %v132_v15 = vld.sshfl [vmem:[#allocation1 + $0x18] sm:$0xff pattern:$0x75316420] }
  0x2c   :  { %141 = vrot.lane.b32.xlu1 %v131_v14, %s608_s28  ;;  %119 = vrot.lane.b32.xlu2 %v108_v11, %s607_s27  ;;  %152 = vst [vmem:[#allocation1 + $0x10] ss:$2 sm:$0xff] %v646_v0 }
  0x2d   :  { %v129_v16 = vld.sshfl [vmem:[#allocation1] sm:$0xff pattern:$0x75316420]  ;;  %v130_v17 = vld.sshfl [vmem:[#allocation1 + $0x8] sm:$0xff pattern:$0x75316420] }
  0x2e   :  { %139 = vrot.lane.b32.xlu0 %v130_v17, %s608_s28  ;;  %150 = vst [vmem:[#allocation1] ss:$2 sm:$0xff] %v648_v1 }
  0x33   :  { %v155_v18 = vld.sshfl [vmem:[#allocation1 + $0x10] sm:$0xff pattern:$0x75316420]  ;;  %v156_v19 = vld.sshfl [vmem:[#allocation1 + $0x18] sm:$0xff pattern:$0x75316420] }
  0x34   :  { %143 = vrot.lane.b32.xlu2 %v132_v15, %s608_s28  ;;  %176 = vst [vmem:[#allocation1 + $0x10] ss:$2 sm:$0xff] %v646_v0 }
  0x35   :  { %v154_v20 = vld.sshfl [vmem:[#allocation1 + $0x8] sm:$0xff pattern:$0x75316420]  ;;  %v153_v21 = vld.sshfl [vmem:[#allocation1] sm:$0xff pattern:$0x75316420] }
  0x36   :  { %165 = vrot.lane.b32.xlu0 %v155_v18, %s609_s29  ;;  %163 = vrot.lane.b32.xlu1 %v154_v20, %s609_s29  ;;  %174 = vst [vmem:[#allocation1] ss:$2 sm:$0xff] %v648_v1 }
  0x3b   :  { %v180_v22 = vld.sshfl [vmem:[#allocation1 + $0x18] sm:$0xff pattern:$0x75316420]  ;;  %v179_v23 = vld.sshfl [vmem:[#allocation1 + $0x10] sm:$0xff pattern:$0x75316420] }
  0x3c   :  { %161 = vrot.lane.b32.xlu2 %v153_v21, %s609_s29  ;;  %200 = vst [vmem:[#allocation1 + $0x10] ss:$2 sm:$0xff] %v646_v0  ;;  %v335_v21 = vld [vmem:[#allocation5 + $0x68] sm:$0xff] }
  0x3d   :  { %v177_v24 = vld.sshfl [vmem:[#allocation1] sm:$0xff pattern:$0x75316420]  ;;  %v178_v25 = vld.sshfl [vmem:[#allocation1 + $0x8] sm:$0xff pattern:$0x75316420] }
  0x3e   :  { %191 = vrot.lane.b32.xlu1 %v180_v22, %s610_s30  ;;  %185 = vrot.lane.b32.xlu0 %v177_v24, %s610_s30  ;;  %198 = vst [vmem:[#allocation1] ss:$2 sm:$0xff] %v648_v1 }
  0x43   :  { %v204_v26 = vld.sshfl [vmem:[#allocation1 + $0x18] sm:$0xff pattern:$0x75316420]  ;;  %v203_v27 = vld.sshfl [vmem:[#allocation1 + $0x10] sm:$0xff pattern:$0x75316420] }
  0x44   :  { %167 = vrot.lane.b32.xlu2 %v156_v19, %s609_s29  ;;  %224 = vst [vmem:[#allocation1 + $0x10] ss:$2 sm:$0xff] %v646_v0  ;;  %v334_v19 = vld [vmem:[#allocation5 + $0x60] sm:$0xff] }
  0x45   :  { %v201_v28 = vld.sshfl [vmem:[#allocation1] sm:$0xff pattern:$0x75316420]  ;;  %v202_v29 = vld.sshfl [vmem:[#allocation1 + $0x8] sm:$0xff pattern:$0x75316420] }
  0x46   :  { %189 = vrot.lane.b32.xlu1 %v179_v23, %s610_s30  ;;  %209 = vrot.lane.b32.xlu0 %v201_v28, %s611_s5  ;;  %222 = vst [vmem:[#allocation1] ss:$2 sm:$0xff] %v648_v1  ;;  %v330_v28 = vld [vmem:[#allocation5 + $0x40] sm:$0xff] }
  0x4b   :  { %v227_v30 = vld.sshfl [vmem:[#allocation1 + $0x10] sm:$0xff pattern:$0x75316420]  ;;  %v228_v31 = vld.sshfl [vmem:[#allocation1 + $0x18] sm:$0xff pattern:$0x75316420] }
  0x4c   :  { %187 = vrot.lane.b32.xlu2 %v178_v25, %s610_s30  ;;  %272 = vst [vmem:[#allocation1 + $0x10] ss:$2 sm:$0xff] %v646_v0 }
  0x4d   :  { %v225_v32 = vld.sshfl [vmem:[#allocation1] sm:$0xff pattern:$0x75316420]  ;;  %v226_v33 = vld.sshfl [vmem:[#allocation1 + $0x8] sm:$0xff pattern:$0x75316420] }
  0x4e   :  { %211 = vrot.lane.b32.xlu1 %v202_v29, %s611_s5  ;;  %215 = vrot.lane.b32.xlu0 %v204_v26, %s611_s5  ;;  %270 = vst [vmem:[#allocation1] ss:$2 sm:$0xff] %v648_v1 }
  0x54   :  { %213 = vrot.lane.b32.xlu2 %v203_v27, %s611_s5 }
  0x55   :  { %v273_v14 = vld.sshfl [vmem:[#allocation1] sm:$0xff pattern:$0x75316420]  ;;  %v274_v15 = vld.sshfl [vmem:[#allocation1 + $0x8] sm:$0xff pattern:$0x75316420] }
  0x56   :  { %237 = vrot.lane.b32.xlu0 %v227_v30, %s612_s6  ;;  %233 = vrot.lane.b32.xlu1 %v225_v32, %s612_s6  ;;  %v331_v30 = vld [vmem:[#allocation5 + $0x48] sm:$0xff] }
  0x5c   :  { %235 = vrot.lane.b32.xlu2 %v226_v33, %s612_s6 }
  0x5e   :  { %65 = vrot.lane.b32.xlu0 %v657_v5, %s605_s0  ;;  %239 = vrot.lane.b32.xlu1 %v228_v31, %s612_s6 }
  0x64   :  { %89 = vrot.lane.b32.xlu2 %v663_v9, %s606_s3  ;;  %v613_v9 = vmov 0  }
  0x65   :  { %521 = vset.pattern.permute.xlu2 %v613_v9  ;;  %522 = vset.pattern.permute.xlu0 %v613_v9 }
  0x66   :  { %113 = vrot.lane.b32.xlu0 %v105_v13, %s607_s27  ;;  %137 = vrot.lane.b32.xlu1 %v129_v16, %s608_s28 }
  0x6c   :  { %366 = vperm.xlu2 %521, %v363_v3  }
  0x6e   :  { %63 = vrot.lane.b32.xlu1 %v655_v4, %s605_s0 }
  0x76   :  { %v94_v34 = vpop.permute.xlu2 %93 }
  0x7e   :  { %v696_v37 = vpop.permute.xlu2 %91 }
  0x7f   :  { %v701_v38 = vsel %vm97_vm0, %v696_v37, %v94_v34 }
  0x86   :  { %v703_v39 = vpop.permute.xlu0 %67  ;;  %v705_v40 = vpop.permute.xlu2 %119 }
  0x87   :  { %v707_v41 = vpop.permute.xlu1 %69 }
  0x8e   :  { %v709_v42 = vpop.permute.xlu0 %95  ;;  %v716_v44 = vpop.permute.xlu2 %143 }
  0x8f   :  { %v714_v43 = vsel %vm97_vm0, %v94_v34, %v709_v42 }
  0x96   :  { %v718_v45 = vpop.permute.xlu1 %117  ;;  %v162_v48 = vpop.permute.xlu2 %161 }
  0x97   :  { %v122_v9 = vsel %vm121_vm7, %v718_v45, %v705_v40 }
  0x98   :  { %v720_v46 = vpop.permute.xlu0 %115 }
  0x9e   :  { %v722_v47 = vpop.permute.xlu1 %141  ;;  %v168_v52 = vpop.permute.xlu2 %167 }
  0x9f   :  { %v173_v26 = vsel %vm169_vm2, %v168_v52, %v162_v48  ;;  %v146_v34 = vsel %vm145_vm4, %v722_v47, %v716_v44 }
  0xa0   :  { %v724_v49 = vpop.permute.xlu0 %139 }
  0xa1   :  { %v147_v35 = vsel %vm145_vm4, %v724_v49, %v722_v47 }
  0xa6   :  { %v188_v55 = vpop.permute.xlu2 %187 }
  0xa8   :  { %v166_v50 = vpop.permute.xlu0 %165  ;;  %v164_v51 = vpop.permute.xlu1 %163 }
  0xa9   :  { %v171_v63 = vsel %vm169_vm2, %v164_v51, %v166_v50  ;;  %v172_v0 = vsel %vm169_vm2, %v162_v48, %v164_v51  ;;  %v170_v31 = vsel %vm169_vm2, %v166_v50, %v168_v52 }
  0xaa   :  { %v285_v4 = vrot.slane %v172_v0, 4  ;;  %v286_v5 = vrot.slane %v171_v63, 4 }
  0xac   :  { %v314_v27 = vsel %vm305_vm3, %v273_v14, %v285_v4  ;;  %v315_v29 = vsel %vm305_vm3, %v274_v15, %v286_v5  ;;  %v333_v14 = vld [vmem:[#allocation5 + $0x58] sm:$0xff] }
  0xad   :  { %v350_v50 = vmul.f32 %v330_v28, %v314_v27  ;;  %v351_v52 = vmul.f32 %v331_v30, %v315_v29 }
  0xae   :  { %v214_v58 = vpop.permute.xlu2 %213 }
  0xb0   :  { %v726_v53 = vpop.permute.xlu1 %191  ;;  %v728_v54 = vpop.permute.xlu0 %185 }
  0xb1   :  { %v196_v10 = vsel %vm193_vm5, %v728_v54, %v188_v55  ;;  %v197_v47 = vsel %vm193_vm5, %v726_v53, %v728_v54  ;;  %v336_v54 = vld [vmem:[#allocation5 + $0x70] sm:$0xff] }
  0xb6   :  { %v236_v6 = vpop.permute.xlu2 %235 }
  0xb8   :  { %v730_v56 = vpop.permute.xlu1 %189  ;;  %v210_v57 = vpop.permute.xlu0 %209 }
  0xb9   :  { %v195_v11 = vsel %vm193_vm5, %v188_v55, %v730_v56  ;;  %v275_v55 = vld.sshfl [vmem:[#allocation1 + $0x10] sm:$0xff pattern:$0x75316420]  ;;  %v194_v63 = vsel %vm193_vm5, %v730_v56, %v726_v53  ;;  %v253_v53 = vrot.slane %v714_v43, 4 }
  0xbe   :  { %v90_v30 = vpop.permute.xlu2 %89 }
  0xc0   :  { %v212_v59 = vpop.permute.xlu1 %211  ;;  %v216_v60 = vpop.permute.xlu0 %215 }
  0xc1   :  { %v219_v61 = vsel %vm217_vm1, %v212_v59, %v214_v58  ;;  %v220_v62 = vsel %vm217_vm1, %v210_v57, %v212_v59  ;;  %v218_v22 = vsel %vm217_vm1, %v214_v58, %v216_v60  ;;  %v221_v23 = vsel %vm217_vm1, %v216_v60, %v210_v57  ;;  %v340_v59 = vld [vmem:[#allocation5 + $0x90] sm:$0xf]  ;;  %v341_v60 = vld [vmem:[#allocation5 + $0x98] sm:$0xf] }
  0xc2   :  { %v297_v1 = vrot.slane %v220_v62, 4  ;;  %v298_v2 = vrot.slane %v219_v61, 4  ;;  %v299_v48 = vrot.slane %v218_v22, 4  ;;  %v300_v51 = vrot.slane %v221_v23, 4 }
  0xc3   :  { %v288_v57 = vrot.slane %v173_v26, 4  ;;  %v287_v58 = vrot.slane %v170_v31, 4  ;;  %v265_v61 = vrot.slane %v146_v34, 4  ;;  %v264_v62 = vrot.slane %v147_v35, 4  ;;  %v324_v26 = vld [vmem:[#allocation5 + $0x10] sm:$0xff] }
  0xc4   :  { %v318_v18 = vsel %vm305_vm3, %v196_v10, %v297_v1  ;;  %v319_v20 = vsel %vm305_vm3, %v195_v11, %v298_v2  ;;  %v276_v2 = vld.sshfl [vmem:[#allocation1 + $0x18] sm:$0xff pattern:$0x75316420]  ;;  %v320_v5 = vsel %vm305_vm3, %v194_v63, %v299_v48  ;;  %v123_v10 = vsel %vm121_vm7, %v720_v46, %v718_v45  ;;  %v362_v34 = vld [vmem:[%s865_s1] sm:$0xf]  ;;  %s614_s1 = smov [#allocation7]  }
  0xc5   :  { %v354_v32 = vmul.f32 %v334_v19, %v318_v18  ;;  %v355_v33 = vmul.f32 %v335_v21, %v319_v20  ;;  %v316_v11 = vsel %vm305_vm3, %v275_v55, %v287_v58  ;;  %v356_v15 = vmul.f32 %v336_v54, %v320_v5  ;;  %v328_v19 = vld [vmem:[#allocation5 + $0x30] sm:$0xff]  ;;  %v329_v21 = vld [vmem:[#allocation5 + $0x38] sm:$0xff]  ;;  %s486_s10 = sshll.u32 %s614_s1, 4  ;;  %s487_s10 = int_to_ptr.vmem [resolvable:$true] %s486_s10 }
  0xc6   :  { %v74_v45 = vsel %vm73_vm8, %v703_v39, %v707_v41  ;;  %v312_v18 = vsel %vm305_vm3, %v123_v10, %v264_v62  ;;  %v313_v20 = vsel %vm305_vm3, %v122_v9, %v265_v61  ;;  %v100_v55 = vsel %vm97_vm0, %v90_v30, %v696_v37  ;;  %v322_v62 = vld [vmem:[#allocation5] sm:$0xff]  ;;  %v367_v5 = vpop.permute.xlu2 %366 }
  0xc7   :  { %v348_v28 = vmul.f32 %v328_v19, %v312_v18  ;;  %v349_v29 = vmul.f32 %v329_v21, %v313_v20  ;;  %v251_v37 = vrot.slane %v100_v55, 4 }
  0xc8   :  { %v238_v12 = vpop.permute.xlu0 %237  ;;  %v234_v13 = vpop.permute.xlu1 %233 }
  0xc9   :  { %v243_v16 = vsel %vm241_vm6, %v236_v6, %v238_v12  ;;  %v244_v17 = vsel %vm241_vm6, %v234_v13, %v236_v6  ;;  %v321_v6 = vsel %vm305_vm3, %v197_v47, %v300_v51  ;;  %v323_v47 = vld [vmem:[#allocation5 + $0x8] sm:$0xff] }
  0xca   :  { %v358_v24 = vmul.f32 %v338_v7, %v244_v17  ;;  %v359_v25 = vmul.f32 %v339_v8, %v243_v16  ;;  %v337_v7 = vld [vmem:[#allocation5 + $0x78] sm:$0xff]  ;;  %v252_v17 = vrot.slane %v701_v38, 4 }
  0xcb   :  { %v357_v16 = vmul.f32 %v337_v7, %v321_v6 }
  0xcc   :  { %499 = vmatpush.msk.msra.mxu0 %vm305_vm3, %v358_v24  ;;  %501 = vmatpush.msk.msra.mxu1 %vm305_vm3, %v359_v25  ;;  %v309_v24 = vsel %vm305_vm3, %v74_v45, %v253_v53  ;;  %v325_v25 = vld [vmem:[#allocation5 + $0x18] sm:$0xff] }
  0xce   :  { %397 = vmatpush.msra.mxu0 %v354_v32  ;;  %417 = vmatpush.msra.mxu1 %v355_v33  ;;  %v345_v33 = vmul.f32 %v325_v25, %v309_v24 }
  0xd0   :  { %v789_v0 = vpop.permute.xlu0 %65  ;;  %v240_v1 = vpop.permute.xlu1 %239  ;;  %398 = vmatpush.msra.mxu0 %v350_v50  ;;  %418 = vmatpush.msra.mxu1 %v351_v52  ;;  %v326_v50 = vld [vmem:[#allocation5 + $0x20] sm:$0xff]  ;;  %v327_v52 = vld [vmem:[#allocation5 + $0x28] sm:$0xff] }
  0xd1   :  { %v242_v3 = vsel %vm241_vm6, %v238_v12, %v240_v1  ;;  %v245_v4 = vsel %vm241_vm6, %v240_v1, %v234_v13  ;;  %v332_v12 = vld [vmem:[#allocation5 + $0x50] sm:$0xff]  ;;  %v317_v13 = vsel %vm305_vm3, %v276_v2, %v288_v57  ;;  %v75_v43 = vsel %vm73_vm8, %v789_v0, %v703_v39 }
  0xd2   :  { %v360_v56 = vmul.f32 %v340_v59, %v242_v3  ;;  %v361_v8 = vmul.f32 %v341_v60, %v245_v4  ;;  %v352_v22 = vmul.f32 %v332_v12, %v316_v11  ;;  %v353_v23 = vmul.f32 %v333_v14, %v317_v13 }
  0xd3   :  { %v308_v38 = vsel %vm305_vm3, %v75_v43, %v252_v17  ;;  %v101_v59 = vsel %vm97_vm0, %v709_v42, %v90_v30 }
  0xd4   :  { %503 = vmatpush.msk.msra.mxu2 %vm305_vm3, %v360_v56  ;;  %505 = vmatpush.msk.msra.mxu3 %vm305_vm3, %v361_v8  ;;  %v344_v51 = vmul.f32 %v324_v26, %v308_v38 }
  0xd6   :  { %437 = vmatpush.msra.mxu2 %v356_v15  ;;  %457 = vmatpush.msra.mxu3 %v357_v16 }
  0xd8   :  { %v114_v27 = vpop.permute.xlu0 %113  ;;  %438 = vmatpush.msra.mxu2 %v352_v22  ;;  %458 = vmatpush.msra.mxu3 %v353_v23  ;;  %v138_v39 = vpop.permute.xlu1 %137 }
  0xd9   :  { %v148_v31 = vsel %vm145_vm4, %v138_v39, %v724_v49  ;;  %v149_v32 = vsel %vm145_vm4, %v716_v44, %v138_v39  ;;  %v124_v49 = vsel %vm121_vm7, %v114_v27, %v720_v46  ;;  %v125_v44 = vsel %vm121_vm7, %v705_v40, %v114_v27 }
  0xda   :  { %v262_v35 = vrot.slane %v149_v32, 4  ;;  %v263_v48 = vrot.slane %v148_v31, 4  ;;  %439 = vmatpush.msra.mxu2 %v348_v28  ;;  %459 = vmatpush.msra.mxu3 %v349_v29  ;;  %v250_v40 = vrot.slane %v101_v59, 4 }
  0xdc   :  { %440 = vmatpush.msra.mxu2 %v344_v51  ;;  %460 = vmatpush.msra.mxu3 %v345_v33  ;;  %v310_v57 = vsel %vm305_vm3, %v125_v44, %v262_v35  ;;  %v311_v58 = vsel %vm305_vm3, %v124_v49, %v263_v48 }
  0xdd   :  { %506 = vmatmul.msk.f32.vlgmr.msra.gmra.mxu3 %vm369_vm9, %v362_v34  ;;  %v346_v46 = vmul.f32 %v326_v50, %v310_v57  ;;  %v347_v60 = vmul.f32 %v327_v52, %v311_v58  ;;  %504 = vmatmul.msk.f32.vlgmr.msra.gmra.mxu2 %vm369_vm9, %v362_v34 }
  0xdf   :  { %399 = vmatpush.msra.mxu0 %v346_v46  ;;  %419 = vmatpush.msra.mxu1 %v347_v60 }
  0xe0   :  { %v64_v61 = vpop.permute.xlu1 %63 }
  0xe1   :  { %v76_v63 = vsel %vm73_vm8, %v64_v61, %v789_v0  ;;  %v77_v42 = vsel %vm73_vm8, %v707_v41, %v64_v61 }
  0xe2   :  { %v306_v1 = vsel %vm305_vm3, %v77_v42, %v250_v40  ;;  %v307_v2 = vsel %vm305_vm3, %v76_v63, %v251_v37 }
  0xe3   :  { %v342_v3 = vmul.f32 %v322_v62, %v306_v1  ;;  %v343_v4 = vmul.f32 %v323_v47, %v307_v2 }
  0xe5   :  { %400 = vmatpush.msra.mxu0 %v342_v3  ;;  %420 = vmatpush.msra.mxu1 %v343_v4 }
  0xe6   :  { %500 = vmatmul.msk.f32.vlgmr.msra.gmra.mxu0 %vm369_vm9, %v362_v34  ;;  %502 = vmatmul.msk.f32.vlgmr.msra.gmra.mxu1 %vm369_vm9, %v362_v34 }
 0x160   :  { %v462_v54 = vpop.f32.mrf.mxu3  ;;  %v442_v6 = vpop.f32.mrf.mxu2 }
 0x161   :  { %v463_v0 = vadd.f32 %v462_v54, %v367_v5  ;;  %v443_v7 = vadd.f32 %v442_v6, %v367_v5 }
 0x163   :  { %v468_v53 = vmax.f32 %v463_v0, 0.0  ;;  %v402_v36 = vpop.f32.mrf.mxu0  ;;  %v422_v41 = vpop.f32.mrf.mxu1  ;;  %v467_v56 = vmax.f32 %v443_v7, 0.0 }
 0x164   :  { %v403_v8 = vadd.f32 %v402_v36, %v367_v5  ;;  %v423_v9 = vadd.f32 %v422_v41, %v367_v5 }
 0x165   :  { %v474_v10 = vrot.slane %v468_v53, 4 }
 0x166   :  { %v466_v11 = vmax.f32 %v423_v9, 0.0  ;;  %v465_v13 = vmax.f32 %v403_v8, 0.0 }
 0x167   :  { %v476_v12 = vsel %vm305_vm3, %v467_v56, %v474_v10 }
 0x168   :  { %v473_v14 = vrot.slane %v466_v11, 4  ;;  %480 = vst [vmem:[#allocation7 + $0x8] sm:$0xff] %v476_v12 }
 0x16a   :  { %v475_v43 = vsel %vm305_vm3, %v465_v13, %v473_v14 }
 0x16b   :  { %479 = vst [vmem:[#allocation7] sm:$0xff] %v475_v43 }
 0x16c   :  { %491 = dma.vmem_to_hbm [thread:$0]  %s487_s10, 256, %s489_s13, [#allocation4]  }
 0x16d   :  { %599 = dma.done.wait [#allocation4], 256  }
 0x16e   :  { %600 = vsyncadd [#allocation4], 4294967040 }
 0x16f   :  { %496 = vsyncpa [#allocation3], 1 }
 0x170   :  { %497 = vsyncpa [#allocation6], 1 }
 0x171   :  { %498 = vsyncpa [#allocation4], 1 }

</bundles_post_ra>
